<compile_context>
chip_gen: v7x
topology: tpu7x:2x2x1
jax: 0.10.0
libtpu: 0.0.40
codegen_flags: <defaults>
</compile_context>

<pallas_src>
import functools
import math

import jax
import jax.numpy as jnp
from jax.experimental import pallas as pl
from jax.experimental.pallas import tpu as pltpu

_K = 1.0  # module's self.k


def _round_up(x, m):
    return (x + m - 1) // m * m


def _image_level_loss_kernel(logits_ref, classes_ref, out_ref, m_ref, s_ref,
                             *, n_real, tile_n, log_inv_n, k, needs_mask):
    n_idx = pl.program_id(1)

    # Reset running accumulators at the start of each row-block's N sweep.
    @pl.when(n_idx == 0)
    def _init():
        m_ref[...] = jnp.full_like(m_ref, -jnp.inf)
        s_ref[...] = jnp.zeros_like(s_ref)

    x = logits_ref[...]
    if x.dtype != jnp.float32:
        x = x.astype(jnp.float32)
    if k != 1.0:
        x = x * k

    if needs_mask:
        col = n_idx * tile_n + jax.lax.broadcasted_iota(jnp.int32, x.shape, 1)
        mask = col < n_real
        xm = jnp.where(mask, x, -jnp.inf)
    else:
        mask = None
        xm = x

    # Online logsumexp update for this spatial tile.
    tile_max = jnp.max(xm, axis=-1, keepdims=True)            # (rb, 1)
    m_prev = m_ref[...]
    m_new = jnp.maximum(m_prev, tile_max)
    p = jnp.exp(x - m_new)                                     # (rb, tile_n)
    if mask is not None:
        p = jnp.where(mask, p, 0.0)
    s_ref[...] = (s_ref[...] * jnp.exp(m_prev - m_new)
                  + jnp.sum(p, axis=-1, keepdims=True))
    m_ref[...] = m_new

    # Finalize: lse -> z -> stable BCE-with-logits, per row.
    @pl.when(n_idx == pl.num_programs(1) - 1)
    def _finalize():
        lse = jnp.log(s_ref[...]) + m_ref[...]                 # (rb, 1)
        z = lse + log_inv_n
        if k != 1.0:
            z = z / k
        y = classes_ref[...].astype(jnp.float32)               # (rb, 1)
        # Equivalent to binary_cross_entropy(sigmoid(z), y), but NaN-free.
        loss = jnp.maximum(z, 0.0) - y * z + jnp.log1p(jnp.exp(-jnp.abs(z)))
        out_ref[...] = loss


def image_level_loss(logits, classes, norm=False, k=_K):
    """logits: (B, C, H, W) float; classes: (B, C) float in [0, 1]."""
    # `norm` is unused in the reference forward; kept for signature parity.
    B, C, H, W = logits.shape
    R = B * C
    N = H * W

    x2d = logits.reshape(R, N).astype(jnp.float32)
    y2d = classes.reshape(R, 1).astype(jnp.float32)

    # --- tiling ---
    tile_n = min(2048, _round_up(N, 128))       # lane tile (>=128, <=2048)
    n_pad = _round_up(N, tile_n)
    rb = min(_round_up(R, 8), 64)               # row block (multiple of 8)
    r_pad = _round_up(R, rb)

    if n_pad != N or r_pad != R:
        x2d = jnp.pad(x2d, ((0, r_pad - R), (0, n_pad - N)))
    if r_pad != R:
        y2d = jnp.pad(y2d, ((0, r_pad - R), (0, 0)))

    grid = (r_pad // rb, n_pad // tile_n)

    kernel = functools.partial(
        _image_level_loss_kernel,
        n_real=N,
        tile_n=tile_n,
        log_inv_n=float(math.log(1.0 / N)),
        k=float(k),
        needs_mask=(n_pad != N),
    )

    tile_bytes = rb * tile_n * 4
    vmem_limit = max(4 * tile_bytes + (1 << 20), 16 * 1024 * 1024)
    vmem_limit = min(vmem_limit, 64 * 1024 * 1024)

    cost = pl.CostEstimate(
        flops=5 * r_pad * n_pad,
        transcendentals=r_pad * n_pad,
        bytes_accessed=r_pad * n_pad * 4 + 3 * r_pad * 4,
    )

    per_row_loss = pl.pallas_call(
        kernel,
        out_shape=jax.ShapeDtypeStruct((r_pad, 1), jnp.float32),
        grid_spec=pltpu.PrefetchScalarGridSpec(
            num_scalar_prefetch=0,
            grid=grid,
            in_specs=[
                pl.BlockSpec((rb, tile_n), lambda r, n: (r, n)),
                pl.BlockSpec((rb, 1), lambda r, n: (r, 0)),
            ],
            out_specs=pl.BlockSpec((rb, 1), lambda r, n: (r, 0)),
            scratch_shapes=[
                pltpu.VMEM((rb, 1), jnp.float32),   # running max
                pltpu.VMEM((rb, 1), jnp.float32),   # running exp-sum
            ],
        ),
        compiler_params=pltpu.CompilerParams(
            dimension_semantics=("parallel", "arbitrary"),
            vmem_limit_bytes=vmem_limit,
        ),
        cost_estimate=cost,
    )(x2d, y2d)

    # Tiny epilogue: drop padded rows and take the mean over B*C elements.
    return jnp.mean(per_row_loss[:R, 0])


def _reference(logits, classes, k=_K):
    # Pure-JAX reference for sanity checking (matches the PyTorch module).
    B, C, H, W = logits.shape
    N = H * W
    x = logits.reshape(B, C, N).astype(jnp.float32) * k
    lse = jax.scipy.special.logsumexp(x, axis=-1)
    z = (jnp.log(1.0 / N) + lse) / k
    pt = jax.nn.sigmoid(z)
    y = classes.astype(jnp.float32)
    loss = -(y * jnp.log(pt) + (1.0 - y) * jnp.log(1.0 - pt))
    return jnp.mean(loss)


if __name__ == "__main__":
    key = jax.random.PRNGKey(0)

    ok = True
    # (B, C, H, W) test shapes: the canonical small case, a ragged/padded case
    # (exercises row padding + lane masking), and a multi-tile streaming case.
    for shape in [(2, 4, 16, 16), (2, 3, 19, 23), (1, 4, 64, 64)]:
        key, k1, k2 = jax.random.split(key, 3)
        B, C, H, W = shape
        logits = jax.random.normal(k1, shape, dtype=jnp.float32)
        classes = jax.random.bernoulli(k2, p=0.5, shape=(B, C)).astype(jnp.float32)

        loss = image_level_loss(logits, classes)
        jax.block_until_ready(loss)
        ref = _reference(logits, classes)
        if not jnp.allclose(loss, ref, rtol=1e-5, atol=1e-5):
            ok = False
            print("MISMATCH", shape, float(loss), float(ref))

    if ok:
        print("KERNEL_OK")
</pallas_src>

<mosaic_0001>
module attributes {stable_mosaic.version = 11 : i64} {
  func.func @_image_level_loss_kernel(%arg0: i32, %arg1: i32, %arg2: memref<8x256xf32, #tpu.memory_space<vmem>>, %arg3: memref<8x1xf32, #tpu.memory_space<vmem>>, %arg4: memref<8x1xf32, #tpu.memory_space<vmem>>, %arg5: memref<8x1xf32, #tpu.memory_space<vmem>>, %arg6: memref<8x1xf32, #tpu.memory_space<vmem>>) attributes {dimension_semantics = [#tpu.dimension_semantics<parallel>, #tpu.dimension_semantics<arbitrary>], iteration_bounds = array<i64: 1, 1>, scalar_prefetch = 0 : i64, scratch_operands = 2 : i64, tpu.core_type = #tpu.core_type<tc>, window_params = [{transform_indices = @transform_0, window_bounds = array<i64: 8, 256>}, {transform_indices = @transform_1, window_bounds = array<i64: 8, 1>}, {transform_indices = @transform_2, window_bounds = array<i64: 8, 1>}]} {
    %c0_i32 = arith.constant 0 : i32
    %0 = arith.cmpi eq, %arg1, %c0_i32 : i32
    %1 = arith.extui %0 : i1 to i32
    %c0_i32_0 = arith.constant 0 : i32
    %2 = arith.cmpi ne, %1, %c0_i32_0 : i32
    scf.if %2 {
      %cst_13 = arith.constant 0xFF800000 : f32
      %23 = vector.broadcast %cst_13 : f32 to vector<8x1xf32>
      %c0_14 = arith.constant 0 : index
      %c0_15 = arith.constant 0 : index
      %24 = vector.load %arg5[%c0_14, %c0_15] : memref<8x1xf32, #tpu.memory_space<vmem>>, vector<8x1xf32>
      tpu.vector_store %arg5[%c0_14, %c0_15], %23 {strides = array<i32>} : memref<8x1xf32, #tpu.memory_space<vmem>>, vector<8x1xf32>,
      %cst_16 = arith.constant 0.000000e+00 : f32
      %25 = vector.broadcast %cst_16 : f32 to vector<8x1xf32>
      %c0_17 = arith.constant 0 : index
      %c0_18 = arith.constant 0 : index
      %26 = vector.load %arg6[%c0_17, %c0_18] : memref<8x1xf32, #tpu.memory_space<vmem>>, vector<8x1xf32>
      tpu.vector_store %arg6[%c0_17, %c0_18], %25 {strides = array<i32>} : memref<8x1xf32, #tpu.memory_space<vmem>>, vector<8x1xf32>,
    } else {
    }
    %c0 = arith.constant 0 : index
    %c0_1 = arith.constant 0 : index
    %3 = vector.load %arg2[%c0, %c0_1] : memref<8x256xf32, #tpu.memory_space<vmem>>, vector<8x256xf32>
    %cst = arith.constant dense<0xFF800000> : vector<8xf32>
    %4 = vector.multi_reduction <maximumf>, %3, %cst [1] : vector<8x256xf32> to vector<8xf32>
    %5 = vector.shape_cast %4 : vector<8xf32> to vector<8x1xf32>
    %c0_2 = arith.constant 0 : index
    %c0_3 = arith.constant 0 : index
    %6 = vector.load %arg5[%c0_2, %c0_3] : memref<8x1xf32, #tpu.memory_space<vmem>>, vector<8x1xf32>
    %7 = arith.maximumf %6, %5 : vector<8x1xf32>
    %8 = vector.broadcast %7 : vector<8x1xf32> to vector<8x256xf32>
    %9 = arith.subf %3, %8 : vector<8x256xf32>
    %10 = math.exp %9 : vector<8x256xf32>
    %c0_4 = arith.constant 0 : index
    %c0_5 = arith.constant 0 : index
    %11 = vector.load %arg6[%c0_4, %c0_5] : memref<8x1xf32, #tpu.memory_space<vmem>>, vector<8x1xf32>
    %12 = arith.subf %6, %7 : vector<8x1xf32>
    %13 = math.exp %12 : vector<8x1xf32>
    %14 = arith.mulf %11, %13 : vector<8x1xf32>
    %cst_6 = arith.constant dense<0.000000e+00> : vector<8xf32>
    %15 = vector.multi_reduction <add>, %10, %cst_6 [1] : vector<8x256xf32> to vector<8xf32>
    %16 = vector.shape_cast %15 : vector<8xf32> to vector<8x1xf32>
    %17 = arith.addf %14, %16 : vector<8x1xf32>
    %c0_7 = arith.constant 0 : index
    %c0_8 = arith.constant 0 : index
    %18 = vector.load %arg6[%c0_7, %c0_8] : memref<8x1xf32, #tpu.memory_space<vmem>>, vector<8x1xf32>
    tpu.vector_store %arg6[%c0_7, %c0_8], %17 {strides = array<i32>} : memref<8x1xf32, #tpu.memory_space<vmem>>, vector<8x1xf32>,
    %c0_9 = arith.constant 0 : index
    %c0_10 = arith.constant 0 : index
    %19 = vector.load %arg5[%c0_9, %c0_10] : memref<8x1xf32, #tpu.memory_space<vmem>>, vector<8x1xf32>
    tpu.vector_store %arg5[%c0_9, %c0_10], %7 {strides = array<i32>} : memref<8x1xf32, #tpu.memory_space<vmem>>, vector<8x1xf32>,
    %c0_i32_11 = arith.constant 0 : i32
    %20 = arith.cmpi eq, %arg1, %c0_i32_11 : i32
    %21 = arith.extui %20 : i1 to i32
    %c0_i32_12 = arith.constant 0 : i32
    %22 = arith.cmpi ne, %21, %c0_i32_12 : i32
    scf.if %22 {
      %c0_13 = arith.constant 0 : index
      %c0_14 = arith.constant 0 : index
      %23 = vector.load %arg6[%c0_13, %c0_14] : memref<8x1xf32, #tpu.memory_space<vmem>>, vector<8x1xf32>
      %24 = math.log %23 : vector<8x1xf32>
      %c0_15 = arith.constant 0 : index
      %c0_16 = arith.constant 0 : index
      %25 = vector.load %arg5[%c0_15, %c0_16] : memref<8x1xf32, #tpu.memory_space<vmem>>, vector<8x1xf32>
      %26 = arith.addf %24, %25 : vector<8x1xf32>
      %cst_17 = arith.constant -5.54517746 : f32
      %27 = vector.broadcast %cst_17 : f32 to vector<8x1xf32>
      %28 = arith.addf %26, %27 : vector<8x1xf32>
      %c0_18 = arith.constant 0 : index
      %c0_19 = arith.constant 0 : index
      %29 = vector.load %arg3[%c0_18, %c0_19] : memref<8x1xf32, #tpu.memory_space<vmem>>, vector<8x1xf32>
      %cst_20 = arith.constant 0.000000e+00 : f32
      %30 = vector.broadcast %cst_20 : f32 to vector<8x1xf32>
      %31 = arith.maximumf %28, %30 : vector<8x1xf32>
      %32 = arith.mulf %29, %28 : vector<8x1xf32>
      %33 = arith.subf %31, %32 : vector<8x1xf32>
      %34 = math.absf %28 : vector<8x1xf32>
      %cst_21 = arith.constant 0.000000e+00 : f32
      %35 = vector.broadcast %cst_21 : f32 to vector<8x1xf32>
      %36 = arith.subf %35, %34 : vector<8x1xf32>
      %37 = math.exp %36 : vector<8x1xf32>
      %38 = math.log1p %37 : vector<8x1xf32>
      %39 = arith.addf %33, %38 : vector<8x1xf32>
      %c0_22 = arith.constant 0 : index
      %c0_23 = arith.constant 0 : index
      %40 = vector.load %arg4[%c0_22, %c0_23] : memref<8x1xf32, #tpu.memory_space<vmem>>, vector<8x1xf32>
      tpu.vector_store %arg4[%c0_22, %c0_23], %39 {strides = array<i32>} : memref<8x1xf32, #tpu.memory_space<vmem>>, vector<8x1xf32>,
    } else {
    }
    return
  }
  func.func @transform_0(%arg0: i32, %arg1: i32) -> (i32, i32) {
    %c0_i32 = arith.constant 0 : i32
    return %arg0, %arg1 : i32, i32
  }
  func.func @transform_1(%arg0: i32, %arg1: i32) -> (i32, i32) {
    %c0_i32 = arith.constant 0 : i32
    %c0_i32_0 = arith.constant 0 : i32
    return %arg0, %c0_i32 : i32, i32
  }
  func.func @transform_2(%arg0: i32, %arg1: i32) -> (i32, i32) {
    %c0_i32 = arith.constant 0 : i32
    %c0_i32_0 = arith.constant 0 : i32
    return %arg0, %c0_i32 : i32, i32
  }
}

</mosaic_0001>

<bundles_post_ra>
// kernel: tpu_custom_call.1
= control target key start
LH: loop header
LB: loop body
LE: loop exit
PB: predicated region body
PF: predicated region fallthrough
CT: control target
= control target key end

     0   :  { %7 = vsyncpa [#allocation5], 0  ;;  %s134_s9 = smov [#allocation4]   ;;  %s176_s0 = inlined_call_operand.hbm [shape: f32[8,256], index: 0, kind: input, shape index: {}]   ;;  %s177_s1 = inlined_call_operand.vmem [shape: f32[8,1], index: 1, kind: input, shape index: {}]   ;;  %s178_s2 = inlined_call_operand.vmem [shape: f32[8,1], index: 2, kind: output, shape index: {}]  }
   0x1   :  { %s14_s10 = sshll.u32 %s134_s9, 4  ;;  %s110_s13 = scalar_lea.hbm %s176_s0, 256  ;;  %s15_s10 = int_to_ptr.vmem [resolvable:$true] %s14_s10 }
   0x2   :  { %p111_p0 = scmp.ne.s32.totalorder %s176_s0, %s110_s13  ;;  %p114_p1 = scmp.lt.u32.totalorder %s110_s13, %s176_s0 }
   0x4   :  { %p116_p2 = pnand %p114_p1, %p111_p0 }
   0x6   :  { %119 = shalt.err (!%p116_p2)
}
   0x7   :  { %s120_s18 = scalar_lea.vmem %s15_s10, 256  ;;  %p125_p4 = scmp.lt.s32.totalorder %s15_s10, %s15_s10 }
   0x8   :  { %p121_p3 = scmp.ne.s32.totalorder %s15_s10, %s120_s18  ;;  %p126_p5 = scmp.lt.s32.totalorder %s120_s18, %s120_s18 }
   0xa   :  { %p127_p6 = por %p126_p5, %p125_p4 }
   0xc   :  { %p128_p7 = pnand %p127_p6, %p121_p3 }
   0xe   :  { %131 = shalt.err (!%p128_p7)
}
   0xf   :  { %17 = dma.hbm_to_vmem [thread:$0]  %s176_s0, 256, %s15_s10, [#allocation5]  }
  0x10   :  { %132 = dma.done.wait [#allocation5], 256  }
  0x11   :  { %133 = vsyncadd [#allocation5], 4294967040  ;;  %vm27_vm0 = vcmask 7168   ;;  %v135_v0 = vmov -inf   ;;  %v30_v1 = vld [vmem:[#allocation4] sm:$0xff]  ;;  %v31_v2 = vld [vmem:[#allocation4 + $0x8] sm:$0xff] }
  0x12   :  { %28 = vst.msk [vmem:[#allocation2] sm:$0xff] %vm27_vm0, %v135_v0  ;;  %v32_v3 = vmax.f32 %v30_v1, %v31_v2  ;;  %v136_v4 = vmov 0   ;;  %v137_v5 = vmov 0.0   ;;  %v69_v36 = vld [vmem:[%s177_s1] sm:$0xff] }
  0x13   :  { %97 = vset.pattern.permute.xlu0 %v136_v4  ;;  %29 = vst.msk [vmem:[#allocation3] sm:$0xff] %vm27_vm0, %v137_v5 }
  0x14   :  { %33 = vmax.xlane.f32.xlu0 %v32_v3 }
  0x19   :  { %v35_v6 = vld [vmem:[#allocation2] sm:$0xff] }
  0x1a   :  { %v48_v20 = vld [vmem:[#allocation3] sm:$0xff] }
  0xa1   :  { %v34_v7 = vpop.xlane.xlu0 %33 }
  0xa2   :  { %v36_v8 = vmax.f32 %v35_v6, %v34_v7 }
  0xa4   :  { %v49_v9 = vsub.f32 %v35_v6, %v36_v8  ;;  %59 = vst.msk [vmem:[#allocation2] sm:$0xff] %vm27_vm0, %v36_v8  ;;  %39 = vperm.xlu0 %97, %v36_v8  }
  0xa6   :  { %v50_v18 = vmul.f32 1.442695, %v49_v9 }
  0xab   :  { %v66_v27 = vld [vmem:[#allocation2] sm:$0xff] }
 0x123   :  { %v40_v10 = vpop.permute.xlu0 %39 }
 0x124   :  { %v42_v11 = vsub.f32 %v30_v1, %v40_v10  ;;  %v43_v12 = vsub.f32 %v31_v2, %v40_v10 }
 0x126   :  { %v44_v13 = vmul.f32 1.442695, %v42_v11  ;;  %v46_v14 = vmul.f32 1.442695, %v43_v12 }
 0x128   :  { %98 = vpow2.f32 %v44_v13 }
 0x129   :  { %100 = vpow2.f32 %v46_v14 }
 0x12a   :  { %102 = vpow2.f32 %v50_v18 }
 0x132   :  { %v99_v15 = vpop.eup %98 }
 0x133   :  { %v101_v16 = vpop.eup %100 }
 0x134   :  { %v53_v17 = vadd.f32 %v101_v16, %v99_v15  ;;  %v103_v19 = vpop.eup %102 }
 0x135   :  { %v52_v21 = vmul.f32 %v103_v19, %v48_v20 }
 0x136   :  { %54 = vadd.xlane.f32.xlu1 %v53_v17 }
 0x1c3   :  { %v55_v22 = vpop.xlane.xlu1 %54 }
 0x1c4   :  { %v56_v23 = vadd.f32 %v55_v22, %v52_v21 }
 0x1c6   :  { %58 = vst.msk [vmem:[#allocation3] sm:$0xff] %vm27_vm0, %v56_v23 }
 0x1cd   :  { %v63_v24 = vld [vmem:[#allocation3] sm:$0xff] }
 0x1ce   :  { %104 = vlog2.f32 %v63_v24 }
 0x1d8   :  { %v105_v25 = vpop.eup %104 }
 0x1d9   :  { %v65_v26 = vmul.f32 0.6931472, %v105_v25 }
 0x1db   :  { %v67_v28 = vadd.f32 %v66_v27, %v65_v26 }
 0x1dd   :  { %v68_v29 = vadd.f32 -5.5451775, %v67_v28 }
 0x1df   :  { %v73_v30 = vand.u32 2147483647, %v68_v29  ;;  %v70_v38 = vmax.f32 %v68_v29, 0.0  ;;  %v71_v39 = vmul.f32 %v69_v36, %v68_v29 }
 0x1e1   :  { %v74_v31 = vsub.f32 0.0, %v73_v30  ;;  %v72_v44 = vsub.f32 %v70_v38, %v71_v39 }
 0x1e3   :  { %v75_v32 = vmul.f32 1.442695, %v74_v31 }
 0x1e5   :  { %106 = vpow2.f32 %v75_v32 }
 0x1ef   :  { %v107_v33 = vpop.eup %106 }
 0x1f0   :  { %v77_v34 = vadd.f32 1.0, %v107_v33  ;;  %v80_v35 = vmul.f32 -0.5, %v107_v33  ;;  %v83_v40 = vand.u32 2147483647, %v107_v33 }
 0x1f2   :  { %108 = vlog2.f32 %v77_v34  ;;  %v81_v37 = vadd.f32 1.0, %v80_v35  ;;  %vm84_vm1 = vcmp.lt.f32.partialorder %v83_v40, 0.0004427343 }
 0x1f4   :  { %v82_v43 = vmul.f32 %v107_v33, %v81_v37 }
 0x1fc   :  { %v109_v41 = vpop.eup %108 }
 0x1fd   :  { %v79_v42 = vmul.f32 0.6931472, %v109_v41 }
 0x1ff   :  { %v85_v45 = vsel %vm84_vm1, %v82_v43, %v79_v42 }
 0x200   :  { %v86_v46 = vadd.f32 %v85_v45, %v72_v44 }
 0x202   :  { %87 = vst.msk [vmem:[%s178_s2] sm:$0xff] %vm27_vm0, %v86_v46 }
 0x203   :  { %92 = vsyncpa [#allocation5], 1 }

</bundles_post_ra>
